<compile_context>
chip_gen: v6e
topology: v6e:2x2x1
jax: 0.10.0
libtpu: 0.0.40
codegen_flags: <defaults>
</compile_context>

<pallas_src>
import functools
import re

import jax
import jax.numpy as jnp
from jax.experimental import pallas as pl
from jax.experimental.pallas import tpu as pltpu


def _round_up(v, m):
    return ((v + m - 1) // m) * m


def _tpu_generation():
    """Best-effort TPU generation (4/5/6/7...); 0 if unknown / not a TPU."""
    try:
        dev = jax.devices()[0]
        if dev.platform != "tpu":
            return 0
        m = re.search(r"(\d+)", dev.device_kind)
        return int(m.group(1)) if m else 0
    except Exception:
        return 0


def _blockspec(shape, index_map, *, single_buffer=False):
    """BlockSpec, optionally single-buffered (grid-invariant blocks: VMEM reclaim)."""
    if single_buffer:
        try:
            return pl.BlockSpec(shape, index_map, pipeline_mode=pl.Buffered(1))
        except Exception:  # older jax without pipeline_mode support
            pass
    return pl.BlockSpec(shape, index_map)


def _mix_linear_kernel(x_ref, mask_ref, sel_ref, w_ref, scale_col_ref,
                       wcache_ref, bias_ref, out_ref,
                       q_scr, scale_scr, outl_scr):
    """Fused outlier extraction, per-row int8 quant, GEMM, dequant, outlier GEMM, bias.

    Grid is (M tiles ["parallel"], N tiles ["arbitrary"]); N is innermost/sequential,
    so quantization of this M tile is computed once (at j == 0) and reused from VMEM
    scratch for every N tile.
    """
    @pl.when(pl.program_id(1) == 0)
    def _():
        x_bf = x_ref[...]                                         # (tm, K) bf16
        # Outlier activations via one-hot selector matmul (exact: picks bf16 cols).
        outl_scr[...] = jnp.dot(
            x_bf, sel_ref[...], preferred_element_type=jnp.float32
        ).astype(jnp.bfloat16)                                    # (tm, fpP)

        # Zero outlier columns ({0,1} mask -> exact in bf16) and per-row abs max
        # (comparisons are exact in bf16); scale math in f32.
        x_z = x_bf * mask_ref[...]                                # (tm, K) bf16
        row_max = jnp.max(jnp.abs(x_z), axis=-1, keepdims=True).astype(jnp.float32)
        x_scale = row_max * (1.0 / 127.0)                         # (tm, 1) f32
        scale_scr[...] = x_scale
        safe = jnp.where(x_scale > 0.0, x_scale, 1.0)
        inv = pl.reciprocal(safe, approx=False)                   # (tm, 1) f32 (EUP)

        # Quantize in K-chunks straight into q_scr (f32 math per chunk) so no
        # (tm, K) f32 temporary stays live across the whole pass.
        K = x_ref.shape[1]
        qk = K
        for cand in (2048, 1024, 512):
            if K > cand and K % cand == 0:
                qk = cand
                break
        for c0 in range(0, K, qk):
            q_f = jnp.round(x_z[:, c0:c0 + qk].astype(jnp.float32) * inv)
            if q_scr.dtype == jnp.int8:
                q_scr[:, c0:c0 + qk] = q_f.astype(jnp.int32).astype(jnp.int8)
            else:
                q_scr[:, c0:c0 + qk] = q_f.astype(q_scr.dtype)

    # Main GEMM: q_x @ weight (weight pre-transposed to (K, N) in the wrapper).
    if q_scr.dtype == jnp.int8:
        # Native int8 MXU (v4/v5e/v6e): bit-exact i32 accumulation, no per-step
        # (K, tn) int8 -> bf16 cast riding on the VPU.
        y = jnp.dot(q_scr[...], w_ref[...],
                    preferred_element_type=jnp.int32).astype(jnp.float32)
    else:
        # v7x (no integer MXU mode) / unknown: bf16 x bf16 -> f32 (exact for
        # int8-valued operands while partial sums stay < 2^24).
        y = jnp.dot(q_scr[...], w_ref[...].astype(jnp.bfloat16),
                    preferred_element_type=jnp.float32)           # (tm, tn)

    # Outlier correction GEMM: act_outliers @ weight_cache (pre-transposed).
    outl = jnp.dot(outl_scr[...], wcache_ref[...],
                   preferred_element_type=jnp.float32)            # (tm, tn)

    # Dequantize + outlier term + bias; lane-dense (tm, tn) bf16 store.
    deq = y * (scale_scr[...] * scale_col_ref[...])
    out_ref[...] = (deq + outl + bias_ref[...]).astype(out_ref.dtype)


@functools.partial(jax.jit, static_argnames=("tile_m", "tile_n", "compat"))
def mix_linear_gemm_sm90(x, weight_i8, scale_col, ind, weight_cache, bias,
                         *, tile_m=None, tile_n=None, compat=False):
    """Pallas TPU forward of MixLinear_GEMM_SM90 (bit=8, arch==9 unfused path).

    `compat=True` disables the int8-MXU and single-buffering features (fallback for
    stacks / chips where those lowerings are unavailable); the math is identical.
    """
    K = x.shape[-1]
    N, Kw = weight_i8.shape
    assert K == Kw
    fp = int(ind.shape[0])
    assert fp >= 1, "this path assumes a non-empty outlier index set"
    assert N % 128 == 0, "out_features must be a multiple of 128"
    out_batch_shape = x.shape[:-1] + (N,)

    gen = _tpu_generation()
    use_int_mxu = (gen in (4, 5, 6)) and not compat   # v7x has no integer MXU mode
    q_dtype = jnp.int8 if use_int_mxu else jnp.bfloat16
    single_buf = not compat

    # Activations stream as bf16 (TPU has no native fp16 compute; halves DMA vs f32).
    inputs = x.reshape(-1, K).astype(jnp.bfloat16)
    M = inputs.shape[0]

    # --- per-generation tiling ---------------------------------------------------
    if tile_m is None:
        if gen in (4, 5, 6):
            tile_m = 512          # 128 MiB VMEM: big M tiles halve weight re-streaming
        elif gen >= 7:
            tile_m = 128          # 64 MiB VMEM: keep full-K blocks small
        else:
            tile_m = 256
    tm = _round_up(min(tile_m, _round_up(max(M, 1), 32)), 32)   # 32: int8 sublane pack
    Mp = _round_up(M, tm)
    if Mp != M:
        inputs = jnp.pad(inputs, ((0, Mp - M), (0, 0)))

    if tile_n is not None:
        tn_candidates = (tile_n,)
    elif gen in (2, 3, 4, 5, 6):
        tn_candidates = (512, 256, 128)
    else:
        tn_candidates = (256, 128)
    tn = next((c for c in tn_candidates if c <= N and N % c == 0), None)
    assert tn is not None, "out_features must be a multiple of 128"

    # --- grid-invariant / small operands (weight prep) ----------------------------
    # TODO(synk): in production the (K, N) int8 transpose and the padded selector /
    #             weight_cache layouts would be prepared once at load (from_linear),
    #             not per call; here they are cheap jitted pre-ops.
    fpP = _round_up(fp, 128)                      # pad outlier dim to full lanes
    sel = jnp.zeros((K, fpP), jnp.bfloat16).at[ind, jnp.arange(fp)].set(1.0)
    mask = jnp.ones((1, K), jnp.bfloat16).at[0, ind].set(0.0)
    w_t = weight_i8.T                                             # (K, N) int8
    wcache_t = jnp.zeros((fpP, N), jnp.bfloat16).at[:fp, :].set(
        weight_cache.astype(jnp.bfloat16).T)
    scale_col_f = scale_col.astype(jnp.float32).reshape(1, N)
    bias_f = (jnp.zeros((N,), jnp.float32) if bias is None
              else bias.astype(jnp.float32)).reshape(1, N)

    grid = (Mp // tm, N // tn)

    # --- explicit VMEM budget ------------------------------------------------------
    q_bytes = 1 if use_int_mxu else 2
    streamed = 2 * (tm * K * 2            # x (bf16)
                    + K * tn * 1          # int8 weight tile
                    + fpP * tn * 2        # weight_cache tile
                    + tn * 4 + tn * 4     # scale_col + bias tiles
                    + tm * tn * 2         # output tile
                    + K * 2 + K * fpP * 2)  # mask + selector (counted x2, conservative)
    scratch = tm * K * q_bytes + tm * 4 + tm * fpP * 2
    vmem_need = streamed + scratch
    vmem_cap = (96 << 20) if gen in (2, 3, 4, 5, 6) else (48 << 20)
    vmem_limit = int(min(vmem_cap, vmem_need + max(vmem_need // 2, 8 << 20)))

    y = pl.pallas_call(
        _mix_linear_kernel,
        out_shape=jax.ShapeDtypeStruct((Mp, N), jnp.bfloat16),
        grid_spec=pltpu.PrefetchScalarGridSpec(
            num_scalar_prefetch=0,
            grid=grid,
            in_specs=[
                pl.BlockSpec((tm, K), lambda i, j: (i, 0)),             # x rows (bf16)
                _blockspec((1, K), lambda i, j: (0, 0),
                           single_buffer=single_buf),                   # zeroing mask
                _blockspec((K, fpP), lambda i, j: (0, 0),
                           single_buffer=single_buf),                   # one-hot selector
                pl.BlockSpec((K, tn), lambda i, j: (0, j)),             # int8 weight tile
                pl.BlockSpec((1, tn), lambda i, j: (0, j)),             # scale_col tile
                pl.BlockSpec((fpP, tn), lambda i, j: (0, j)),           # weight_cache tile
                pl.BlockSpec((1, tn), lambda i, j: (0, j)),             # bias tile
            ],
            out_specs=pl.BlockSpec((tm, tn), lambda i, j: (i, j)),
            scratch_shapes=[
                pltpu.VMEM((tm, K), q_dtype),        # cached quantized activations
                pltpu.VMEM((tm, 1), jnp.float32),    # cached per-row scale
                pltpu.VMEM((tm, fpP), jnp.bfloat16), # cached outlier activations
            ],
        ),
        # N axis must stay sequential per core so the per-M-tile quant cache
        # (computed at j == 0) is valid; M axis is sharded across TensorCores.
        compiler_params=pltpu.CompilerParams(
            dimension_semantics=("parallel", "arbitrary"),
            vmem_limit_bytes=vmem_limit),
    )(inputs, mask, sel, w_t, scale_col_f, wcache_t, bias_f)

    # Single fused slice + fp16 cast (wrapper is jitted -> no extra HBM pass).
    return y[:M].astype(jnp.float16).reshape(out_batch_shape)


def reference_forward(x, weight_i8, scale_col, ind, weight_cache, bias):
    """Pure-JAX reference of the same forward path.

    Activations are taken through the same bf16 storage dtype the TPU kernel streams
    (TPU has no fp16 compute), so the check isolates the kernel arithmetic; all math
    below is f32, weights exact.
    """
    K = x.shape[-1]
    N = weight_i8.shape[0]
    inputs = x.reshape(-1, K).astype(jnp.bfloat16).astype(jnp.float32)
    outliers = inputs[:, ind]
    zeroed = inputs.at[:, ind].set(0.0)
    row_max = jnp.max(jnp.abs(zeroed), axis=-1, keepdims=True)
    x_scale = row_max * (1.0 / 127.0)
    safe = jnp.where(x_scale > 0.0, x_scale, 1.0)
    q = jnp.round(zeroed * (1.0 / safe))
    y = q @ weight_i8.astype(jnp.float32).T
    out = y * x_scale * scale_col.astype(jnp.float32).reshape(1, N)
    out = out + outliers @ weight_cache.astype(jnp.float32).T
    if bias is not None:
        out = out + bias.astype(jnp.float32).reshape(1, N)
    return out.astype(jnp.float16).reshape(x.shape[:-1] + (N,))


if __name__ == "__main__":
    # Small, module-consistent shapes.
    batch, seq = 2, 8
    in_features, out_features, fp_features_num = 256, 128, 32

    key = jax.random.PRNGKey(0)
    kx, kw, ks, ki, kc, kb = jax.random.split(key, 6)

    # Activation (fp16), as x in forward().
    x = jax.random.normal(kx, (batch, seq, in_features), jnp.float32).astype(jnp.float16)

    # Deterministic synthetic buffers matching __init__ shapes/dtypes.
    weight_i8 = jax.random.randint(kw, (out_features, in_features), -127, 128,
                                   dtype=jnp.int32).astype(jnp.int8)
    scale_col = jax.random.uniform(ks, (1, out_features), jnp.float32,
                                   0.01, 0.05).astype(jnp.float16)
    ind = jnp.sort(jax.random.permutation(ki, in_features)[:fp_features_num]).astype(jnp.int32)
    weight_cache = (jax.random.normal(kc, (out_features, fp_features_num), jnp.float32)
                    * 0.05).astype(jnp.float16)
    bias = (jax.random.normal(kb, (out_features,), jnp.float32) * 0.1).astype(jnp.float16)

    run = functools.partial(mix_linear_gemm_sm90, x, weight_i8, scale_col, ind,
                            weight_cache, bias)
    try:
        y = jax.block_until_ready(run())
    except Exception:
        # Defensive compat retry: disables the int8-MXU dot and single-buffer
        # pipeline_mode on stacks/chips where those lowerings are unavailable;
        # identical math, previously-validated bf16/double-buffer structure.
        y = jax.block_until_ready(run(compat=True))

    y_ref = jax.block_until_ready(
        reference_forward(x, weight_i8, scale_col, ind, weight_cache, bias))

    assert y.shape == (batch, seq, out_features)
    assert y.dtype == jnp.float16
    assert jnp.allclose(y.astype(jnp.float32), y_ref.astype(jnp.float32),
                        atol=1e-1, rtol=5e-2), "mismatch vs reference"
    print("KERNEL_OK")
</pallas_src>

<mosaic_0001>
module attributes {stable_mosaic.version = 11 : i64} {
  func.func @_mix_linear_kernel(%arg0: i32, %arg1: i32, %arg2: memref<32x256xbf16, #tpu.memory_space<vmem>>, %arg3: memref<1x256xbf16, #tpu.memory_space<vmem>>, %arg4: memref<256x128xbf16, #tpu.memory_space<vmem>>, %arg5: memref<256x128xi8, #tpu.memory_space<vmem>>, %arg6: memref<1x128xf32, #tpu.memory_space<vmem>>, %arg7: memref<128x128xbf16, #tpu.memory_space<vmem>>, %arg8: memref<1x128xf32, #tpu.memory_space<vmem>>, %arg9: memref<32x128xbf16, #tpu.memory_space<vmem>>, %arg10: memref<32x256xbf16, #tpu.memory_space<vmem>>, %arg11: memref<32x1xf32, #tpu.memory_space<vmem>>, %arg12: memref<32x128xbf16, #tpu.memory_space<vmem>>) attributes {dimension_semantics = [#tpu.dimension_semantics<parallel>, #tpu.dimension_semantics<arbitrary>], iteration_bounds = array<i64: 1, 1>, scalar_prefetch = 0 : i64, scratch_operands = 3 : i64, tpu.core_type = #tpu.core_type<tc>, window_params = [{transform_indices = @transform_0, window_bounds = array<i64: 32, 256>}, {pipeline_mode = #tpu.pipeline_mode<synchronous>, transform_indices = @transform_1, window_bounds = array<i64: 1, 256>}, {pipeline_mode = #tpu.pipeline_mode<synchronous>, transform_indices = @transform_2, window_bounds = array<i64: 256, 128>}, {transform_indices = @transform_3, window_bounds = array<i64: 256, 128>}, {transform_indices = @transform_4, window_bounds = array<i64: 1, 128>}, {transform_indices = @transform_5, window_bounds = array<i64: 128, 128>}, {transform_indices = @transform_6, window_bounds = array<i64: 1, 128>}, {transform_indices = @transform_7, window_bounds = array<i64: 32, 128>}]} {
    %c0_i32 = arith.constant 0 : i32
    %0 = arith.cmpi eq, %arg1, %c0_i32 : i32
    %1 = arith.extui %0 : i1 to i32
    %c0_i32_0 = arith.constant 0 : i32
    %2 = arith.cmpi ne, %1, %c0_i32_0 : i32
    scf.if %2 {
      %c0_17 = arith.constant 0 : index
      %c0_18 = arith.constant 0 : index
      %22 = vector.load %arg2[%c0_17, %c0_18] : memref<32x256xbf16, #tpu.memory_space<vmem>>, vector<32x256xbf16>
      %c0_19 = arith.constant 0 : index
      %c0_20 = arith.constant 0 : index
      %23 = vector.load %arg4[%c0_19, %c0_20] : memref<256x128xbf16, #tpu.memory_space<vmem>>, vector<256x128xbf16>
      %cst_21 = arith.constant dense<0.000000e+00> : vector<32x128xf32>
      %24 = tpu.matmul %22, %23, %cst_21 {dimension_numbers = #tpu.dot_dimension_numbers<[1], [0], [0], [1], [0, 0, 1, 1], [], []>} : vector<32x256xbf16>, vector<256x128xbf16>, vector<32x128xf32> -> vector<32x128xf32>
      %25 = arith.truncf %24 : vector<32x128xf32> to vector<32x128xbf16>
      %c0_22 = arith.constant 0 : index
      %c0_23 = arith.constant 0 : index
      %26 = vector.load %arg12[%c0_22, %c0_23] : memref<32x128xbf16, #tpu.memory_space<vmem>>, vector<32x128xbf16>
      tpu.vector_store %arg12[%c0_22, %c0_23], %25 {strides = array<i32>} : memref<32x128xbf16, #tpu.memory_space<vmem>>, vector<32x128xbf16>,
      %c0_24 = arith.constant 0 : index
      %c0_25 = arith.constant 0 : index
      %27 = vector.load %arg3[%c0_24, %c0_25] : memref<1x256xbf16, #tpu.memory_space<vmem>>, vector<1x256xbf16>
      %28 = vector.broadcast %27 : vector<1x256xbf16> to vector<32x256xbf16>
      %29 = arith.mulf %22, %28 : vector<32x256xbf16>
      %30 = math.absf %29 : vector<32x256xbf16>
      %cst_26 = arith.constant dense<0xFF80> : vector<32xbf16>
      %31 = vector.multi_reduction <maximumf>, %30, %cst_26 [1] : vector<32x256xbf16> to vector<32xbf16>
      %32 = vector.shape_cast %31 : vector<32xbf16> to vector<32x1xbf16>
      %33 = arith.extf %32 : vector<32x1xbf16> to vector<32x1xf32>
      %cst_27 = arith.constant 0.00787401571 : f32
      %34 = vector.broadcast %cst_27 : f32 to vector<32x1xf32>
      %35 = arith.mulf %33, %34 : vector<32x1xf32>
      %c0_28 = arith.constant 0 : index
      %c0_29 = arith.constant 0 : index
      %36 = vector.load %arg11[%c0_28, %c0_29] : memref<32x1xf32, #tpu.memory_space<vmem>>, vector<32x1xf32>
      tpu.vector_store %arg11[%c0_28, %c0_29], %35 {strides = array<i32>} : memref<32x1xf32, #tpu.memory_space<vmem>>, vector<32x1xf32>,
      %cst_30 = arith.constant 0.000000e+00 : f32
      %37 = vector.broadcast %cst_30 : f32 to vector<32x1xf32>
      %38 = arith.cmpf ogt, %35, %37 : vector<32x1xf32>
      %cst_31 = arith.constant 1.000000e+00 : f32
      %39 = vector.broadcast %cst_31 : f32 to vector<32x1xf32>
      %40 = arith.select %38, %35, %39 : vector<32x1xi1>, vector<32x1xf32>
      %41 = tpu.reciprocal %40 : vector<32x1xf32> -> vector<32x1xf32>
      %42 = arith.extf %29 : vector<32x256xbf16> to vector<32x256xf32>
      %43 = vector.broadcast %41 : vector<32x1xf32> to vector<32x256xf32>
      %44 = arith.mulf %42, %43 : vector<32x256xf32>
      %45 = math.roundeven %44 : vector<32x256xf32>
      %46 = arith.truncf %45 : vector<32x256xf32> to vector<32x256xbf16>
      %c0_32 = arith.constant 0 : index
      %c0_33 = arith.constant 0 : index
      %47 = vector.load %arg10[%c0_32, %c0_33] : memref<32x256xbf16, #tpu.memory_space<vmem>>, vector<32x256xbf16>
      tpu.vector_store %arg10[%c0_32, %c0_33], %46 {strides = array<i32>} : memref<32x256xbf16, #tpu.memory_space<vmem>>, vector<32x256xbf16>,
    } else {
    }
    %c0 = arith.constant 0 : index
    %c0_1 = arith.constant 0 : index
    %3 = vector.load %arg10[%c0, %c0_1] : memref<32x256xbf16, #tpu.memory_space<vmem>>, vector<32x256xbf16>
    %c0_2 = arith.constant 0 : index
    %c0_3 = arith.constant 0 : index
    %4 = vector.load %arg5[%c0_2, %c0_3] : memref<256x128xi8, #tpu.memory_space<vmem>>, vector<256x128xi8>
    %5 = arith.sitofp %4 : vector<256x128xi8> to vector<256x128xbf16>
    %cst = arith.constant dense<0.000000e+00> : vector<32x128xf32>
    %6 = tpu.matmul %3, %5, %cst {dimension_numbers = #tpu.dot_dimension_numbers<[1], [0], [0], [1], [0, 0, 1, 1], [], []>} : vector<32x256xbf16>, vector<256x128xbf16>, vector<32x128xf32> -> vector<32x128xf32>
    %c0_4 = arith.constant 0 : index
    %c0_5 = arith.constant 0 : index
    %7 = vector.load %arg12[%c0_4, %c0_5] : memref<32x128xbf16, #tpu.memory_space<vmem>>, vector<32x128xbf16>
    %c0_6 = arith.constant 0 : index
    %c0_7 = arith.constant 0 : index
    %8 = vector.load %arg7[%c0_6, %c0_7] : memref<128x128xbf16, #tpu.memory_space<vmem>>, vector<128x128xbf16>
    %cst_8 = arith.constant dense<0.000000e+00> : vector<32x128xf32>
    %9 = tpu.matmul %7, %8, %cst_8 {dimension_numbers = #tpu.dot_dimension_numbers<[1], [0], [0], [1], [0, 0, 1, 1], [], []>} : vector<32x128xbf16>, vector<128x128xbf16>, vector<32x128xf32> -> vector<32x128xf32>
    %c0_9 = arith.constant 0 : index
    %c0_10 = arith.constant 0 : index
    %10 = vector.load %arg11[%c0_9, %c0_10] : memref<32x1xf32, #tpu.memory_space<vmem>>, vector<32x1xf32>
    %c0_11 = arith.constant 0 : index
    %c0_12 = arith.constant 0 : index
    %11 = vector.load %arg6[%c0_11, %c0_12] : memref<1x128xf32, #tpu.memory_space<vmem>>, vector<1x128xf32>
    %12 = vector.broadcast %10 : vector<32x1xf32> to vector<32x128xf32>
    %13 = vector.broadcast %11 : vector<1x128xf32> to vector<32x128xf32>
    %14 = arith.mulf %12, %13 : vector<32x128xf32>
    %15 = arith.mulf %6, %14 : vector<32x128xf32>
    %16 = arith.addf %15, %9 : vector<32x128xf32>
    %c0_13 = arith.constant 0 : index
    %c0_14 = arith.constant 0 : index
    %17 = vector.load %arg8[%c0_13, %c0_14] : memref<1x128xf32, #tpu.memory_space<vmem>>, vector<1x128xf32>
    %18 = vector.broadcast %17 : vector<1x128xf32> to vector<32x128xf32>
    %19 = arith.addf %16, %18 : vector<32x128xf32>
    %20 = arith.truncf %19 : vector<32x128xf32> to vector<32x128xbf16>
    %c0_15 = arith.constant 0 : index
    %c0_16 = arith.constant 0 : index
    %21 = vector.load %arg9[%c0_15, %c0_16] : memref<32x128xbf16, #tpu.memory_space<vmem>>, vector<32x128xbf16>
    tpu.vector_store %arg9[%c0_15, %c0_16], %20 {strides = array<i32>} : memref<32x128xbf16, #tpu.memory_space<vmem>>, vector<32x128xbf16>,
    return
  }
  func.func @transform_0(%arg0: i32, %arg1: i32) -> (i32, i32) {
    %c0_i32 = arith.constant 0 : i32
    %c0_i32_0 = arith.constant 0 : i32
    return %arg0, %c0_i32 : i32, i32
  }
  func.func @transform_1(%arg0: i32, %arg1: i32) -> (i32, i32) {
    %c0_i32 = arith.constant 0 : i32
    %c0_i32_0 = arith.constant 0 : i32
    %c0_i32_1 = arith.constant 0 : i32
    return %c0_i32, %c0_i32_0 : i32, i32
  }
  func.func @transform_2(%arg0: i32, %arg1: i32) -> (i32, i32) {
    %c0_i32 = arith.constant 0 : i32
    %c0_i32_0 = arith.constant 0 : i32
    %c0_i32_1 = arith.constant 0 : i32
    return %c0_i32, %c0_i32_0 : i32, i32
  }
  func.func @transform_3(%arg0: i32, %arg1: i32) -> (i32, i32) {
    %c0_i32 = arith.constant 0 : i32
    %c0_i32_0 = arith.constant 0 : i32
    return %c0_i32, %arg1 : i32, i32
  }
  func.func @transform_4(%arg0: i32, %arg1: i32) -> (i32, i32) {
    %c0_i32 = arith.constant 0 : i32
    %c0_i32_0 = arith.constant 0 : i32
    return %c0_i32, %arg1 : i32, i32
  }
  func.func @transform_5(%arg0: i32, %arg1: i32) -> (i32, i32) {
    %c0_i32 = arith.constant 0 : i32
    %c0_i32_0 = arith.constant 0 : i32
    return %c0_i32, %arg1 : i32, i32
  }
  func.func @transform_6(%arg0: i32, %arg1: i32) -> (i32, i32) {
    %c0_i32 = arith.constant 0 : i32
    %c0_i32_0 = arith.constant 0 : i32
    return %c0_i32, %arg1 : i32, i32
  }
  func.func @transform_7(%arg0: i32, %arg1: i32) -> (i32, i32) {
    %c0_i32 = arith.constant 0 : i32
    return %arg0, %arg1 : i32, i32
  }
}

module attributes {stable_mosaic.version = 11 : i64} {
  func.func @_mix_linear_kernel(%arg0: i32, %arg1: i32, %arg2: memref<32x256xbf16, #tpu.memory_space<vmem>>, %arg3: memref<1x256xbf16, #tpu.memory_space<vmem>>, %arg4: memref<256x128xbf16, #tpu.memory_space<vmem>>, %arg5: memref<256x128xi8, #tpu.memory_space<vmem>>, %arg6: memref<1x128xf32, #tpu.memory_space<vmem>>, %arg7: memref<128x128xbf16, #tpu.memory_space<vmem>>, %arg8: memref<1x128xf32, #tpu.memory_space<vmem>>, %arg9: memref<32x128xbf16, #tpu.memory_space<vmem>>, %arg10: memref<32x256xbf16, #tpu.memory_space<vmem>>, %arg11: memref<32x1xf32, #tpu.memory_space<vmem>>, %arg12: memref<32x128xbf16, #tpu.memory_space<vmem>>) attributes {dimension_semantics = [#tpu.dimension_semantics<parallel>, #tpu.dimension_semantics<arbitrary>], iteration_bounds = array<i64: 1, 1>, scalar_prefetch = 0 : i64, scratch_operands = 3 : i64, tpu.core_type = #tpu.core_type<tc>, window_params = [{transform_indices = @transform_0, window_bounds = array<i64: 32, 256>}, {pipeline_mode = #tpu.pipeline_mode<synchronous>, transform_indices = @transform_1, window_bounds = array<i64: 1, 256>}, {pipeline_mode = #tpu.pipeline_mode<synchronous>, transform_indices = @transform_2, window_bounds = array<i64: 256, 128>}, {transform_indices = @transform_3, window_bounds = array<i64: 256, 128>}, {transform_indices = @transform_4, window_bounds = array<i64: 1, 128>}, {transform_indices = @transform_5, window_bounds = array<i64: 128, 128>}, {transform_indices = @transform_6, window_bounds = array<i64: 1, 128>}, {transform_indices = @transform_7, window_bounds = array<i64: 32, 128>}]} {
    %c0_i32 = arith.constant 0 : i32
    %0 = arith.cmpi eq, %arg1, %c0_i32 : i32
    %1 = arith.extui %0 : i1 to i32
    %c0_i32_0 = arith.constant 0 : i32
    %2 = arith.cmpi ne, %1, %c0_i32_0 : i32
    scf.if %2 {
      %c0_17 = arith.constant 0 : index
      %c0_18 = arith.constant 0 : index
      %22 = vector.load %arg2[%c0_17, %c0_18] : memref<32x256xbf16, #tpu.memory_space<vmem>>, vector<32x256xbf16>
      %c0_19 = arith.constant 0 : index
      %c0_20 = arith.constant 0 : index
      %23 = vector.load %arg4[%c0_19, %c0_20] : memref<256x128xbf16, #tpu.memory_space<vmem>>, vector<256x128xbf16>
      %cst_21 = arith.constant dense<0.000000e+00> : vector<32x128xf32>
      %24 = tpu.matmul %22, %23, %cst_21 {dimension_numbers = #tpu.dot_dimension_numbers<[1], [0], [0], [1], [0, 0, 1, 1], [], []>} : vector<32x256xbf16>, vector<256x128xbf16>, vector<32x128xf32> -> vector<32x128xf32>
      %25 = arith.truncf %24 : vector<32x128xf32> to vector<32x128xbf16>
      %c0_22 = arith.constant 0 : index
      %c0_23 = arith.constant 0 : index
      %26 = vector.load %arg12[%c0_22, %c0_23] : memref<32x128xbf16, #tpu.memory_space<vmem>>, vector<32x128xbf16>
      tpu.vector_store %arg12[%c0_22, %c0_23], %25 {strides = array<i32>} : memref<32x128xbf16, #tpu.memory_space<vmem>>, vector<32x128xbf16>,
      %c0_24 = arith.constant 0 : index
      %c0_25 = arith.constant 0 : index
      %27 = vector.load %arg3[%c0_24, %c0_25] : memref<1x256xbf16, #tpu.memory_space<vmem>>, vector<1x256xbf16>
      %28 = vector.broadcast %27 : vector<1x256xbf16> to vector<32x256xbf16>
      %29 = arith.mulf %22, %28 : vector<32x256xbf16>
      %30 = math.absf %29 : vector<32x256xbf16>
      %cst_26 = arith.constant dense<0xFF80> : vector<32xbf16>
      %31 = vector.multi_reduction <maximumf>, %30, %cst_26 [1] : vector<32x256xbf16> to vector<32xbf16>
      %32 = vector.shape_cast %31 : vector<32xbf16> to vector<32x1xbf16>
      %33 = arith.extf %32 : vector<32x1xbf16> to vector<32x1xf32>
      %cst_27 = arith.constant 0.00787401571 : f32
      %34 = vector.broadcast %cst_27 : f32 to vector<32x1xf32>
      %35 = arith.mulf %33, %34 : vector<32x1xf32>
      %c0_28 = arith.constant 0 : index
      %c0_29 = arith.constant 0 : index
      %36 = vector.load %arg11[%c0_28, %c0_29] : memref<32x1xf32, #tpu.memory_space<vmem>>, vector<32x1xf32>
      tpu.vector_store %arg11[%c0_28, %c0_29], %35 {strides = array<i32>} : memref<32x1xf32, #tpu.memory_space<vmem>>, vector<32x1xf32>,
      %cst_30 = arith.constant 0.000000e+00 : f32
      %37 = vector.broadcast %cst_30 : f32 to vector<32x1xf32>
      %38 = arith.cmpf ogt, %35, %37 : vector<32x1xf32>
      %cst_31 = arith.constant 1.000000e+00 : f32
      %39 = vector.broadcast %cst_31 : f32 to vector<32x1xf32>
      %40 = arith.select %38, %35, %39 : vector<32x1xi1>, vector<32x1xf32>
      %41 = tpu.reciprocal %40 : vector<32x1xf32> -> vector<32x1xf32>
      %42 = arith.extf %29 : vector<32x256xbf16> to vector<32x256xf32>
      %43 = vector.broadcast %41 : vector<32x1xf32> to vector<32x256xf32>
      %44 = arith.mulf %42, %43 : vector<32x256xf32>
      %45 = math.roundeven %44 : vector<32x256xf32>
      %46 = arith.truncf %45 : vector<32x256xf32> to vector<32x256xbf16>
      %c0_32 = arith.constant 0 : index
      %c0_33 = arith.constant 0 : index
      %47 = vector.load %arg10[%c0_32, %c0_33] : memref<32x256xbf16, #tpu.memory_space<vmem>>, vector<32x256xbf16>
      tpu.vector_store %arg10[%c0_32, %c0_33], %46 {strides = array<i32>} : memref<32x256xbf16, #tpu.memory_space<vmem>>, vector<32x256xbf16>,
    } else {
    }
    %c0 = arith.constant 0 : index
    %c0_1 = arith.constant 0 : index
    %3 = vector.load %arg10[%c0, %c0_1] : memref<32x256xbf16, #tpu.memory_space<vmem>>, vector<32x256xbf16>
    %c0_2 = arith.constant 0 : index
    %c0_3 = arith.constant 0 : index
    %4 = vector.load %arg5[%c0_2, %c0_3] : memref<256x128xi8, #tpu.memory_space<vmem>>, vector<256x128xi8>
    %5 = arith.sitofp %4 : vector<256x128xi8> to vector<256x128xbf16>
    %cst = arith.constant dense<0.000000e+00> : vector<32x128xf32>
    %6 = tpu.matmul %3, %5, %cst {dimension_numbers = #tpu.dot_dimension_numbers<[1], [0], [0], [1], [0, 0, 1, 1], [], []>} : vector<32x256xbf16>, vector<256x128xbf16>, vector<32x128xf32> -> vector<32x128xf32>
    %c0_4 = arith.constant 0 : index
    %c0_5 = arith.constant 0 : index
    %7 = vector.load %arg12[%c0_4, %c0_5] : memref<32x128xbf16, #tpu.memory_space<vmem>>, vector<32x128xbf16>
    %c0_6 = arith.constant 0 : index
    %c0_7 = arith.constant 0 : index
    %8 = vector.load %arg7[%c0_6, %c0_7] : memref<128x128xbf16, #tpu.memory_space<vmem>>, vector<128x128xbf16>
    %cst_8 = arith.constant dense<0.000000e+00> : vector<32x128xf32>
    %9 = tpu.matmul %7, %8, %cst_8 {dimension_numbers = #tpu.dot_dimension_numbers<[1], [0], [0], [1], [0, 0, 1, 1], [], []>} : vector<32x128xbf16>, vector<128x128xbf16>, vector<32x128xf32> -> vector<32x128xf32>
    %c0_9 = arith.constant 0 : index
    %c0_10 = arith.constant 0 : index
    %10 = vector.load %arg11[%c0_9, %c0_10] : memref<32x1xf32, #tpu.memory_space<vmem>>, vector<32x1xf32>
    %c0_11 = arith.constant 0 : index
    %c0_12 = arith.constant 0 : index
    %11 = vector.load %arg6[%c0_11, %c0_12] : memref<1x128xf32, #tpu.memory_space<vmem>>, vector<1x128xf32>
    %12 = vector.broadcast %10 : vector<32x1xf32> to vector<32x128xf32>
    %13 = vector.broadcast %11 : vector<1x128xf32> to vector<32x128xf32>
    %14 = arith.mulf %12, %13 : vector<32x128xf32>
    %15 = arith.mulf %6, %14 : vector<32x128xf32>
    %16 = arith.addf %15, %9 : vector<32x128xf32>
    %c0_13 = arith.constant 0 : index
    %c0_14 = arith.constant 0 : index
    %17 = vector.load %arg8[%c0_13, %c0_14] : memref<1x128xf32, #tpu.memory_space<vmem>>, vector<1x128xf32>
    %18 = vector.broadcast %17 : vector<1x128xf32> to vector<32x128xf32>
    %19 = arith.addf %16, %18 : vector<32x128xf32>
    %20 = arith.truncf %19 : vector<32x128xf32> to vector<32x128xbf16>
    %c0_15 = arith.constant 0 : index
    %c0_16 = arith.constant 0 : index
    %21 = vector.load %arg9[%c0_15, %c0_16] : memref<32x128xbf16, #tpu.memory_space<vmem>>, vector<32x128xbf16>
    tpu.vector_store %arg9[%c0_15, %c0_16], %20 {strides = array<i32>} : memref<32x128xbf16, #tpu.memory_space<vmem>>, vector<32x128xbf16>,
    return
  }
  func.func @transform_0(%arg0: i32, %arg1: i32) -> (i32, i32) {
    %c0_i32 = arith.constant 0 : i32
    %c0_i32_0 = arith.constant 0 : i32
    return %arg0, %c0_i32 : i32, i32
  }
  func.func @transform_1(%arg0: i32, %arg1: i32) -> (i32, i32) {
    %c0_i32 = arith.constant 0 : i32
    %c0_i32_0 = arith.constant 0 : i32
    %c0_i32_1 = arith.constant 0 : i32
    return %c0_i32, %c0_i32_0 : i32, i32
  }
  func.func @transform_2(%arg0: i32, %arg1: i32) -> (i32, i32) {
    %c0_i32 = arith.constant 0 : i32
    %c0_i32_0 = arith.constant 0 : i32
    %c0_i32_1 = arith.constant 0 : i32
    return %c0_i32, %c0_i32_0 : i32, i32
  }
  func.func @transform_3(%arg0: i32, %arg1: i32) -> (i32, i32) {
    %c0_i32 = arith.constant 0 : i32
    %c0_i32_0 = arith.constant 0 : i32
    return %c0_i32, %arg1 : i32, i32
  }
  func.func @transform_4(%arg0: i32, %arg1: i32) -> (i32, i32) {
    %c0_i32 = arith.constant 0 : i32
    %c0_i32_0 = arith.constant 0 : i32
    return %c0_i32, %arg1 : i32, i32
  }
  func.func @transform_5(%arg0: i32, %arg1: i32) -> (i32, i32) {
    %c0_i32 = arith.constant 0 : i32
    %c0_i32_0 = arith.constant 0 : i32
    return %c0_i32, %arg1 : i32, i32
  }
  func.func @transform_6(%arg0: i32, %arg1: i32) -> (i32, i32) {
    %c0_i32 = arith.constant 0 : i32
    %c0_i32_0 = arith.constant 0 : i32
    return %c0_i32, %arg1 : i32, i32
  }
  func.func @transform_7(%arg0: i32, %arg1: i32) -> (i32, i32) {
    %c0_i32 = arith.constant 0 : i32
    return %arg0, %arg1 : i32, i32
  }
}

</mosaic_0001>

<bundles_post_ra>
// kernel: mix_linear_gemm_sm90.1
= control target key start
LH: loop header
LB: loop body
LE: loop exit
PB: predicated region body
PF: predicated region fallthrough
CT: control target
= control target key end

     0   :  { %v265_v0 = vlaneseq  ;;  %v995_v2 = vmov 1966171168   ;;  %vm338_vm0 = vcmask 7168   ;;  %s1208_s2 = inlined_call_operand.vmem [shape: bf16[256,128], index: 2, kind: input, shape index: {}]   ;;  %s1209_s0 = inlined_call_operand.vmem [shape: bf16[32,256], index: 0, kind: input, shape index: {}]   ;;  %s1210_s1 = inlined_call_operand.vmem [shape: bf16[1,256], index: 1, kind: input, shape index: {}]   ;;  %s1211_s3 = inlined_call_operand.vmem [shape: s8[256,128], index: 3, kind: input, shape index: {}]   ;;  %s1212_s5 = inlined_call_operand.vmem [shape: bf16[128,128], index: 5, kind: input, shape index: {}]   ;;  %s1213_s4 = inlined_call_operand.vmem [shape: f32[1,128], index: 4, kind: input, shape index: {}]   ;;  %s1214_s6 = inlined_call_operand.vmem [shape: f32[1,128], index: 6, kind: input, shape index: {}]   ;;  %s1215_s7 = inlined_call_operand.vmem [shape: bf16[32,128], index: 7, kind: output, shape index: {}]  }
   0x1   :  { %v957_v1 = vld [vmem:[%s1208_s2 + $0x78] sm:$0xff]   ;;  %v263_v3 = vunpack.c.l.s4 %v995_v2  ;;  %v959_v5 = vld [vmem:[%s1208_s2 + $0x70] sm:$0xff]   ;;  %v961_v9 = vld [vmem:[%s1208_s2 + $0x68] sm:$0xff]  }
   0x2   :  { %v958_v4 = vld [vmem:[%s1208_s2 + $0x38] sm:$0xff]   ;;  %803 = vmatprep.subr.bf16.mxu0 %v957_v1  ;;  %v960_v6 = vld [vmem:[%s1208_s2 + $0x30] sm:$0xff]   ;;  %v266_v8 = vshrl.u32 %v265_v0, 7  ;;  %v962_v10 = vld [vmem:[%s1208_s2 + $0x28] sm:$0xff]  }
   0x3   :  { %804 = vmatpush3.bf16.msra.mxu0 %v958_v4  ;;  %v264_v7 = vunpack.c.0.s8 %v263_v3  ;;  %v963_v12 = vld [vmem:[%s1208_s2 + $0x60] sm:$0xff]   ;;  %v32_v14 = vld [vmem:[%s1209_s0 + $0x8] sm:$0xff]  ;;  %v965_v21 = vld [vmem:[%s1208_s2 + $0x58] sm:$0xff]  }
   0x4   :  { %805 = vmatprep.subr.bf16.mxu0 %v959_v5  ;;  %v31_v13 = vld [vmem:[%s1209_s0] sm:$0xff]  ;;  %v281_v19 = vsub.s32 0, %v266_v8  ;;  %v966_v24 = vld [vmem:[%s1208_s2 + $0x18] sm:$0xff]   ;;  %v967_v27 = vld [vmem:[%s1208_s2 + $0x50] sm:$0xff]  }
   0x5   :  { %v267_v11 = vsub.s32 %v264_v7, %v266_v8  ;;  %v735_v15 = vld.sshfl [vmem:[%s1210_s1] sm:$0x11 pattern:$0x75316420]  ;;  %v712_v20 = vcombine.high %v31_v13, %v32_v14  ;;  %v33_v29 = vld [vmem:[%s1209_s0 + $0x10] sm:$0xff]  ;;  %v34_v30 = vld [vmem:[%s1209_s0 + $0x18] sm:$0xff]  ;;  %v711_v50 = vcombine.low %v31_v13, %v32_v14 }
   0x6   :  { %v964_v16 = vld [vmem:[%s1208_s2 + $0x20] sm:$0xff]   ;;  %v261_v17 = vcombine.high %v735_v15, %v735_v15  ;;  %v968_v32 = vld [vmem:[%s1208_s2 + $0x10] sm:$0xff]   ;;  %v969_v33 = vld [vmem:[%s1208_s2 + $0x48] sm:$0xff]   ;;  %v714_v51 = vcombine.high %v33_v29, %v34_v30  ;;  %v713_v53 = vcombine.low %v33_v29, %v34_v30 }
   0x7   :  { %806 = vmatpush3.bf16.msra.mxu0 %v960_v6  ;;  %v268_v18 = vrot.slane %v735_v15, %v267_v11  ;;  %215 = vmatprep.mubr.bf16.mxu0 %v712_v20  ;;  %v970_v40 = vld [vmem:[%s1208_s2 + $0x8] sm:$0xff]   ;;  %v971_v41 = vld [vmem:[%s1208_s2 + $0x40] sm:$0xff]   ;;  %v418_v54 = vld [vmem:[%s1211_s3 + $0x38] sm:$0xff] }
   0x8   :  { %807 = vmatprep.subr.bf16.mxu0 %v961_v9  ;;  %v275_v22 = vrot.slane %v261_v17, %v267_v11  ;;  %v972_v47 = vld [vmem:[%s1208_s2] sm:$0xff]   ;;  %v434_v55 = vunpack.c.h.s8.bf16 %v418_v54  ;;  %v414_v56 = vld [vmem:[%s1211_s3 + $0x18] sm:$0xff]  ;;  %v433_v58 = vunpack.c.l.s8.bf16 %v418_v54  ;;  %v417_v60 = vld [vmem:[%s1211_s3 + $0x30] sm:$0xff] }
   0x9   :  { %v277_v23 = vpack.i.b16 %v268_v18, %v268_v18  ;;  %v426_v57 = vunpack.c.h.s8.bf16 %v414_v56  ;;  %v425_v59 = vunpack.c.l.s8.bf16 %v414_v56  ;;  %v432_v61 = vunpack.c.h.s8.bf16 %v417_v60  ;;  %v413_v62 = vld [vmem:[%s1211_s3 + $0x10] sm:$0xff]  ;;  %v416_v2 = vld [vmem:[%s1211_s3 + $0x28] sm:$0xff]  ;;  %v415_v7 = vld [vmem:[%s1211_s3 + $0x20] sm:$0xff] }
   0xa   :  { %v284_v26 = vpack.i.b16 %v275_v22, %v275_v22  ;;  %831 = vmatprep.subr.bf16.mxu1 %v434_v55  ;;  %v424_v63 = vunpack.c.h.s8.bf16 %v413_v62  ;;  %v431_v0 = vunpack.c.l.s8.bf16 %v417_v60  ;;  %v423_v1 = vunpack.c.l.s8.bf16 %v413_v62  ;;  %v412_v3 = vld [vmem:[%s1211_s3 + $0x8] sm:$0xff]  ;;  %v977_v15 = vld [vmem:[%s1212_s5 + $0x38] sm:$0xff]   ;;  %v980_v18 = vld [vmem:[%s1212_s5 + $0x20] sm:$0xff]  }
   0xb   :  { %808 = vmatpush3.bf16.msra.mxu0 %v962_v10  ;;  %v282_v25 = vrot.slane %v277_v23, %v281_v19  ;;  %832 = vmatpush3.bf16.msra.mxu1 %v426_v57  ;;  %v430_v4 = vunpack.c.h.s8.bf16 %v416_v2  ;;  %v422_v5 = vunpack.c.h.s8.bf16 %v412_v3  ;;  %v429_v6 = vunpack.c.l.s8.bf16 %v416_v2  ;;  %v411_v10 = vld [vmem:[%s1211_s3] sm:$0xff]  ;;  %v979_v17 = vld [vmem:[%s1212_s5 + $0x28] sm:$0xff]   ;;  %v982_v20 = vld [vmem:[%s1212_s5 + $0x10] sm:$0xff]  }
   0xc   :  { %809 = vmatprep.subr.bf16.mxu0 %v963_v12  ;;  %v289_v28 = vrot.slane %v284_v26, %v281_v19  ;;  %833 = vmatprep.subr.bf16.mxu1 %v433_v58  ;;  %v421_v8 = vunpack.c.l.s8.bf16 %v412_v3  ;;  %v428_v9 = vunpack.c.h.s8.bf16 %v415_v7  ;;  %v420_v11 = vunpack.c.h.s8.bf16 %v411_v10  ;;  %v981_v19 = vld [vmem:[%s1212_s5 + $0x18] sm:$0xff]   ;;  %v985_v22 = vld [vmem:[%s1212_s5] sm:$0xff]  }
   0xd   :  { %v427_v12 = vunpack.c.l.s8.bf16 %v415_v7 }
   0xe   :  { %v736_v31 = vcombine.low %v282_v25, %v289_v28 }
   0xf   :  { %810 = vmatpush3.bf16.msra.mxu0 %v964_v16  ;;  %834 = vmatpush3.bf16.msra.mxu1 %v425_v59  ;;  %v978_v16 = vld [vmem:[%s1212_s5 + $0x30] sm:$0xff]  }
  0x10   :  { %811 = vmatprep.subr.bf16.mxu0 %v965_v21  ;;  %v1091_v34 = vmul.bf16 %v736_v31, %v31_v13  ;;  %v1093_v35 = vmul.bf16 %v736_v31, %v32_v14  ;;  %v1095_v36 = vmul.bf16 %v736_v31, %v33_v29  ;;  %v1097_v37 = vmul.bf16 %v736_v31, %v34_v30  ;;  %v983_v21 = vld [vmem:[%s1212_s5 + $0x8] sm:$0xff]  }
  0x11   :  { %835 = vmatprep.subr.bf16.mxu1 %v432_v61  ;;  %v419_v13 = vunpack.c.l.s8.bf16 %v411_v10  ;;  %v996_v14 = vmov 0  }
  0x12   :  { %v300_v38 = vand.u32 2147450879, %v1091_v34  ;;  %v301_v39 = vand.u32 2147450879, %v1093_v35  ;;  %v302_v44 = vand.u32 2147450879, %v1095_v36  ;;  %955 = vset.pattern.permute.xlu1 %v996_v14  ;;  %956 = vset.pattern.permute.xlu0 %v996_v14  ;;  %v360_v58 = vunpack.c.h.bf16 %v1095_v36 }
  0x13   :  { %812 = vmatpush3.bf16.msra.mxu0 %v966_v24  ;;  %v303_v45 = vand.u32 2147450879, %v1097_v37  ;;  %836 = vmatpush3.bf16.msra.mxu1 %v424_v63  ;;  %v362_v61 = vunpack.c.h.bf16 %v1097_v37 }
  0x14   :  { %813 = vmatprep.subr.bf16.mxu0 %v967_v27  ;;  %v737_v42 = vcombine.low %v300_v38, %v301_v39  ;;  %v738_v43 = vcombine.high %v300_v38, %v301_v39  ;;  %837 = vmatprep.subr.bf16.mxu1 %v431_v0 }
  0x15   :  { %v739_v48 = vcombine.low %v302_v44, %v303_v45  ;;  %v740_v49 = vcombine.high %v302_v44, %v303_v45  ;;  %v356_v44 = vunpack.c.h.bf16 %v1091_v34  ;;  %v358_v45 = vunpack.c.h.bf16 %v1093_v35 }
  0x16   :  { %v324_v46 = vmax.bf16 %v738_v43, %v737_v42  ;;  %v355_v43 = vunpack.c.l.bf16 %v1091_v34 }
  0x17   :  { %814 = vmatpush3.bf16.msra.mxu0 %v968_v32  ;;  %v327_v52 = vmax.bf16 %v740_v49, %v739_v48  ;;  %838 = vmatpush3.bf16.msra.mxu1 %v423_v1 }
  0x18   :  { %815 = vmatprep.subr.bf16.mxu0 %v969_v33  ;;  %325 = vmax.xlane.bf16.xlu0 %v324_v46  ;;  %v357_v46 = vunpack.c.l.bf16 %v1093_v35 }
  0x19   :  { %839 = vmatprep.subr.bf16.mxu1 %v430_v4 }
  0x1b   :  { %816 = vmatpush3.bf16.msra.mxu0 %v970_v40  ;;  %840 = vmatpush3.bf16.msra.mxu1 %v422_v5 }
  0x1c   :  { %817 = vmatprep.subr.bf16.mxu0 %v971_v41  ;;  %841 = vmatprep.subr.bf16.mxu1 %v429_v6 }
  0x1f   :  { %818 = vmatpush3.bf16.msra.mxu0 %v972_v47  ;;  %842 = vmatpush3.bf16.msra.mxu1 %v421_v8 }
  0x20   :  { %328 = vmax.xlane.bf16.xlu0 %v327_v52  ;;  %843 = vmatprep.subr.bf16.mxu1 %v428_v9  ;;  %v361_v9 = vunpack.c.l.bf16 %v1097_v37 }
  0x21   :  { %869 = vmatprep.subr.bf16.mxu0 %v977_v15 }
  0x22   :  { %216 = vmatmul.mubr.bf16.vlgmr.msra.gmra.mxu0 %v711_v50 }
  0x23   :  { %223 = vmatprep.mubr.bf16.mxu0 %v714_v51  ;;  %844 = vmatpush3.bf16.msra.mxu1 %v420_v11 }
  0x24   :  { %845 = vmatprep.subr.bf16.mxu1 %v427_v12  ;;  %870 = vmatpush3.bf16.msra.mxu0 %v977_v15 }
  0x25   :  { %871 = vmatprep.subr.bf16.mxu0 %v978_v16 }
  0x27   :  { %846 = vmatpush3.bf16.msra.mxu1 %v419_v13 }
  0x28   :  { %872 = vmatpush3.bf16.msra.mxu0 %v978_v16 }
  0x29   :  { %873 = vmatprep.subr.bf16.mxu0 %v979_v17 }
  0x2a   :  { %224 = vmatmul.mubr.bf16.gmra.mxu0 %v713_v53  ;;  %v359_v53 = vunpack.c.l.bf16 %v1095_v36 }
  0x2c   :  { %874 = vmatpush3.bf16.msra.mxu0 %v979_v17 }
  0x2d   :  { %875 = vmatprep.subr.bf16.mxu0 %v980_v18 }
  0x30   :  { %876 = vmatpush3.bf16.msra.mxu0 %v980_v18 }
  0x31   :  { %877 = vmatprep.subr.bf16.mxu0 %v981_v19 }
  0x34   :  { %878 = vmatpush3.bf16.msra.mxu0 %v981_v19 }
  0x35   :  { %879 = vmatprep.subr.bf16.mxu0 %v982_v20 }
  0x38   :  { %880 = vmatpush3.bf16.msra.mxu0 %v982_v20 }
  0x39   :  { %881 = vmatprep.subr.bf16.mxu0 %v983_v21 }
  0x3c   :  { %882 = vmatpush3.bf16.msra.mxu0 %v983_v21 }
  0x3d   :  { %883 = vmatprep.subr.bf16.mxu0 %v985_v22 }
  0x40   :  { %884 = vmatpush3.bf16.msra.mxu0 %v985_v22 }
  0xa5   :  { %v326_v23 = vpop.xlane.xlu0 %325 }
  0xa6   :  { %v330_v24 = vunpack.c.l.bf16 %v326_v23  ;;  %v331_v25 = vunpack.c.h.bf16 %v326_v23 }
  0xa8   :  { %v334_v26 = vmul.f32 0.007874016, %v330_v24  ;;  %v335_v27 = vmul.f32 0.007874016, %v331_v25 }
  0xaa   :  { %339 = vst.msk [vmem:[#allocation3] sm:$0xff] %vm338_vm0, %v334_v26  ;;  %340 = vst.msk [vmem:[#allocation3 + $0x8] sm:$0xff] %vm338_vm0, %v335_v27  ;;  %vm343_vm1 = vcmp.gt.f32.partialorder %v334_v26, 0.0  ;;  %vm344_vm2 = vcmp.gt.f32.partialorder %v335_v27, 0.0 }
  0xab   :  { %v347_v28 = vsel %vm343_vm1, %v334_v26, 1.0  ;;  %v348_v29 = vsel %vm344_vm2, %v335_v27, 1.0 }
  0xac   :  { %987 = vrcp.f32 %v347_v28 }
  0xad   :  { %989 = vrcp.f32 %v348_v29  ;;  %v329_v30 = vpop.xlane.xlu0 %328 }
  0xae   :  { %v332_v31 = vunpack.c.l.bf16 %v329_v30  ;;  %v333_v32 = vunpack.c.h.bf16 %v329_v30 }
  0xb0   :  { %v336_v33 = vmul.f32 0.007874016, %v332_v31  ;;  %v337_v38 = vmul.f32 0.007874016, %v333_v32 }
  0xb1   :  { %v633_v39 = vld [vmem:[#allocation3] sm:$0xff]  ;;  %v634_v42 = vld [vmem:[#allocation3 + $0x8] sm:$0xff] }
  0xb2   :  { %341 = vst.msk [vmem:[#allocation3 + $0x10] sm:$0xff] %vm338_vm0, %v336_v33  ;;  %342 = vst.msk [vmem:[#allocation3 + $0x18] sm:$0xff] %vm338_vm0, %v337_v38  ;;  %vm345_vm3 = vcmp.gt.f32.partialorder %v336_v33, 0.0  ;;  %vm346_vm4 = vcmp.gt.f32.partialorder %v337_v38, 0.0  ;;  %640 = vperm.xlu1 %955, %v633_v39  }
  0xb3   :  { %v349_v40 = vsel %vm345_vm3, %v336_v33, 1.0  ;;  %v350_v41 = vsel %vm346_vm4, %v337_v38, 1.0 }
  0xb4   :  { %991 = vrcp.f32 %v349_v40 }
  0xb5   :  { %993 = vrcp.f32 %v350_v41 }
  0xb6   :  { %645 = vperm.xlu1 %955, %v634_v42  }
  0xb9   :  { %v988_v47 = vpop.eup %987  ;;  %v636_v48 = vld [vmem:[#allocation3 + $0x18] sm:$0xff]  ;;  %v635_v49 = vld [vmem:[#allocation3 + $0x10] sm:$0xff] }
  0xba   :  { %v990_v50 = vpop.eup %989  ;;  %v364_v51 = vmul.f32 %v988_v47, %v356_v44  ;;  %v363_v52 = vmul.f32 %v988_v47, %v355_v43  ;;  %655 = vperm.xlu0 %956, %v636_v48   ;;  %650 = vperm.xlu1 %955, %v635_v49  }
  0xbb   :  { %v366_v54 = vmul.f32 %v990_v50, %v358_v45  ;;  %v365_v57 = vmul.f32 %v990_v50, %v357_v46 }
  0xbc   :  { %v897_v55 = vand.u32 2147483647, %v364_v51  ;;  %v899_v56 = vcvt.f32.s32 %v364_v51  ;;  %v889_v34 = vand.u32 2147483647, %v363_v52  ;;  %v891_v35 = vcvt.f32.s32 %v363_v52 }
  0xbd   :  { %v913_v59 = vand.u32 2147483647, %v366_v54  ;;  %v915_v60 = vcvt.f32.s32 %v366_v54  ;;  %v902_v63 = vand.u32 2147483648, %v364_v51  ;;  %v918_v0 = vand.u32 2147483648, %v366_v54 }
  0xbe   :  { %v900_v62 = vcvt.s32.f32 %v899_v56  ;;  %vm1171_vm5 = vcmp.lt.f32.partialorder %v897_v55, 8388608.0  ;;  %v892_v3 = vcvt.s32.f32 %v891_v35  ;;  %v894_v4 = vand.u32 2147483648, %v363_v52 }
  0xbf   :  { %v916_v2 = vcvt.s32.f32 %v915_v60  ;;  %vm1175_vm6 = vcmp.lt.f32.partialorder %v913_v59, 8388608.0  ;;  %vm1179_vm7 = vcmp.lt.f32.partialorder %v889_v34, 8388608.0  ;;  %v907_v7 = vcvt.f32.s32 %v365_v57 }
  0xc0   :  { %v901_v5 = vand.u32 2147483647, %v900_v62  ;;  %v893_v11 = vand.u32 2147483647, %v892_v3  ;;  %v905_v12 = vand.u32 2147483647, %v365_v57 }
  0xc1   :  { %v992_v8 = vpop.eup %991  ;;  %v917_v10 = vand.u32 2147483647, %v916_v2  ;;  %v908_v15 = vcvt.s32.f32 %v907_v7  ;;  %v910_v16 = vand.u32 2147483648, %v365_v57 }
  0xc2   :  { %v994_v13 = vpop.eup %993  ;;  %v903_v14 = vor.u32 %v902_v63, %v901_v5  ;;  %v368_v17 = vmul.f32 %v992_v8, %v360_v58  ;;  %v895_v19 = vor.u32 %v894_v4, %v893_v11  ;;  %v367_v21 = vmul.f32 %v992_v8, %v359_v53 }
  0xc3   :  { %v919_v18 = vor.u32 %v918_v0, %v917_v10  ;;  %v370_v20 = vmul.f32 %v994_v13, %v362_v61  ;;  %v909_v23 = vand.u32 2147483647, %v908_v15  ;;  %vm906_vm8 = vcmp.lt.f32.partialorder %v905_v12, 8388608.0 }
  0xc4   :  { %v904_v22 = vsel %vm1171_vm5, %v903_v14, %v364_v51  ;;  %v929_v24 = vand.u32 2147483647, %v368_v17  ;;  %v931_v25 = vcvt.f32.s32 %v368_v17  ;;  %v896_v26 = vsel %vm1179_vm7, %v895_v19, %v363_v52 }
  0xc5   :  { %v920_v37 = vsel %vm1175_vm6, %v919_v18, %v366_v54  ;;  %v369_v27 = vmul.f32 %v994_v13, %v361_v9  ;;  %v911_v29 = vor.u32 %v910_v16, %v909_v23  ;;  %v934_v31 = vand.u32 2147483648, %v368_v17 }
  0xc6   :  { %v800_v28 = vpack.c.bf16 %v920_v37, %v904_v22  ;;  %v932_v30 = vcvt.s32.f32 %v931_v25  ;;  %v945_v32 = vand.u32 2147483647, %v370_v20  ;;  %v947_v33 = vcvt.f32.s32 %v370_v20  ;;  %v759_v37 = vld [vmem:[%s1213_s4] ss:$0 sm:$0xff] }
  0xc7   :  { %v912_v38 = vsel %vm906_vm8, %v911_v29, %v365_v57  ;;  %vm1190_vm9 = vcmp.lt.f32.partialorder %v929_v24, 8388608.0  ;;  %v923_v41 = vcvt.f32.s32 %v367_v21  ;;  %v950_v44 = vand.u32 2147483648, %v370_v20 }
  0xc8   :  { %487 = vmatprep.mubr.bf16.mxu1 %v800_v28  ;;  %v933_v40 = vand.u32 2147483647, %v932_v30  ;;  %v799_v42 = vpack.c.bf16 %v912_v38, %v896_v26  ;;  %v948_v43 = vcvt.s32.f32 %v947_v33  ;;  %v921_v45 = vand.u32 2147483647, %v367_v21 }
  0xc9   :  { %v924_v47 = vcvt.s32.f32 %v923_v41  ;;  %v926_v48 = vand.u32 2147483648, %v367_v21  ;;  %v939_v49 = vcvt.f32.s32 %v369_v27  ;;  %v937_v51 = vand.u32 2147483647, %v369_v27 }
  0xca   :  { %v935_v46 = vor.u32 %v934_v31, %v933_v40  ;;  %488 = vmatmul.mubr.bf16.vlgmr.msra.gmra.mxu1 %v799_v42  ;;  %v949_v50 = vand.u32 2147483647, %v948_v43  ;;  %vm946_vm10 = vcmp.lt.f32.partialorder %v945_v32, 8388608.0  ;;  %v942_v54 = vand.u32 2147483648, %v369_v27 }
  0xcb   :  { %v925_v52 = vand.u32 2147483647, %v924_v47  ;;  %v940_v53 = vcvt.s32.f32 %v939_v49  ;;  %vm922_vm11 = vcmp.lt.f32.partialorder %v921_v45, 8388608.0  ;;  %vm938_vm12 = vcmp.lt.f32.partialorder %v937_v51, 8388608.0 }
  0xcc   :  { %v936_v55 = vsel %vm1190_vm9, %v935_v46, %v368_v17  ;;  %v951_v56 = vor.u32 %v950_v44, %v949_v50  ;;  %v760_v44 = vld [vmem:[%s1214_s6] ss:$0 sm:$0xff] }
  0xcd   :  { %v927_v57 = vor.u32 %v926_v48, %v925_v52  ;;  %v941_v34 = vand.u32 2147483647, %v940_v53 }
  0xce   :  { %v952_v58 = vsel %vm946_vm10, %v951_v56, %v370_v20 }
  0xcf   :  { %v802_v59 = vpack.c.bf16 %v952_v58, %v936_v55  ;;  %v928_v60 = vsel %vm922_vm11, %v927_v57, %v367_v21  ;;  %v943_v35 = vor.u32 %v942_v54, %v941_v34 }
  0xd1   :  { %495 = vmatprep.mubr.bf16.mxu1 %v802_v59  ;;  %v944_v61 = vsel %vm938_vm12, %v943_v35, %v369_v27 }
  0xd2   :  { %v801_v62 = vpack.c.bf16 %v944_v61, %v928_v60 }
  0xd4   :  { %496 = vmatmul.mubr.bf16.gmra.mxu1 %v801_v62 }
  0xe2   :  { %v819_v63 = vpop.f32.mrf.mxu0 }
  0xe4   :  { %v820_v0 = vpop.f32.mrf.mxu0 }
  0xe5   :  { %v821_v3 = vadd.f32 %v820_v0, %v819_v63 }
  0xe6   :  { %v822_v1 = vpop.f32.mrf.mxu0 }
  0xe8   :  { %v823_v2 = vpop.f32.mrf.mxu0 }
  0xe9   :  { %v824_v4 = vadd.f32 %v823_v2, %v822_v1 }
  0xea   :  { %v825_v5 = vpop.f32.mrf.mxu0 }
  0xeb   :  { %v780_v6 = vpack.c.bf16 %v824_v4, %v821_v3 }
  0xec   :  { %v826_v36 = vpop.f32.mrf.mxu0 }
  0xed   :  { %781 = vst [vmem:[#allocation4] sm:$0xff] %v780_v6   ;;  %v827_v9 = vadd.f32 %v826_v36, %v825_v5 }
  0xee   :  { %v828_v7 = vpop.f32.mrf.mxu0 }
  0xf0   :  { %v829_v8 = vpop.f32.mrf.mxu0 }
  0xf1   :  { %v830_v10 = vadd.f32 %v829_v8, %v828_v7 }
  0xf3   :  { %v785_v11 = vpack.c.bf16 %v830_v10, %v827_v9 }
  0xf4   :  { %v984_v12 = vld [vmem:[#allocation4] sm:$0xff]  }
  0xf5   :  { %797 = vst [vmem:[#allocation4 + $0x8] sm:$0xff] %v785_v11   ;;  %885 = vmatprep.mubr.bf16.mxu0 %v984_v12 }
  0xfc   :  { %v986_v13 = vld [vmem:[#allocation4 + $0x8] sm:$0xff]  }
  0xfd   :  { %886 = vmatmul.mubr.bf16.vlgmr.msra.gmra.mxu0 %v986_v13 }
 0x12d   :  { %v641_v19 = vpop.permute.xlu1 %640 }
 0x12e   :  { %v664_v31 = vmul.f32 %v759_v37, %v641_v19 }
 0x131   :  { %v646_v21 = vpop.permute.xlu1 %645 }
 0x132   :  { %v665_v40 = vmul.f32 %v759_v37, %v646_v21 }
 0x135   :  { %v651_v23 = vpop.permute.xlu1 %650  ;;  %v656_v26 = vpop.permute.xlu0 %655 }
 0x136   :  { %v666_v27 = vmul.f32 %v759_v37, %v651_v23  ;;  %v667_v32 = vmul.f32 %v759_v37, %v656_v26 }
 0x18a   :  { %v847_v14 = vpop.f32.mrf.mxu1 }
 0x18c   :  { %v848_v15 = vpop.f32.mrf.mxu1 }
 0x18d   :  { %v849_v28 = vadd.f32 %v848_v15, %v847_v14 }
 0x18e   :  { %v850_v16 = vpop.f32.mrf.mxu1 }
 0x18f   :  { %v668_v42 = vmul.f32 %v849_v28, %v664_v31 }
 0x190   :  { %v851_v17 = vpop.f32.mrf.mxu1 }
 0x191   :  { %v852_v33 = vadd.f32 %v851_v17, %v850_v16 }
 0x193   :  { %v669_v48 = vmul.f32 %v852_v33, %v665_v40 }
 0x194   :  { %v853_v18 = vpop.f32.mrf.mxu1 }
 0x196   :  { %v854_v20 = vpop.f32.mrf.mxu1 }
 0x197   :  { %v855_v25 = vadd.f32 %v854_v20, %v853_v18 }
 0x198   :  { %v856_v22 = vpop.f32.mrf.mxu1 }
 0x199   :  { %v670_v38 = vmul.f32 %v855_v25, %v666_v27 }
 0x19a   :  { %v857_v24 = vpop.f32.mrf.mxu1 }
 0x19b   :  { %v858_v29 = vadd.f32 %v857_v24, %v856_v22 }
 0x19d   :  { %v671_v43 = vmul.f32 %v858_v29, %v667_v32 }
 0x1bd   :  { %v887_v30 = vpop.f32.mrf.mxu0 }
 0x1be   :  { %v674_v41 = vadd.f32 %v887_v30, %v670_v38 }
 0x1bf   :  { %v618_v39 = vpop.f32.mrf.mxu0 }
 0x1c0   :  { %v672_v46 = vadd.f32 %v668_v42, %v618_v39  ;;  %v685_v50 = vadd.f32 %v760_v44, %v674_v41 }
 0x1c1   :  { %v888_v45 = vpop.f32.mrf.mxu0 }
 0x1c2   :  { %v675_v47 = vadd.f32 %v888_v45, %v671_v43  ;;  %v683_v53 = vadd.f32 %v760_v44, %v672_v46 }
 0x1c3   :  { %v621_v49 = vpop.f32.mrf.mxu0 }
 0x1c4   :  { %v686_v51 = vadd.f32 %v760_v44, %v675_v47  ;;  %v673_v52 = vadd.f32 %v669_v48, %v621_v49 }
 0x1c6   :  { %v795_v54 = vpack.c.bf16 %v686_v51, %v685_v50  ;;  %v684_v55 = vadd.f32 %v760_v44, %v673_v52 }
 0x1c8   :  { %798 = vst [vmem:[%s1215_s7 + $0x8] sm:$0xff] %v795_v54   ;;  %v790_v56 = vpack.c.bf16 %v684_v55, %v683_v53 }
 0x1ca   :  { %791 = vst [vmem:[%s1215_s7] sm:$0xff] %v790_v56  }

// kernel: mix_linear_gemm_sm90.1
= control target key start
LH: loop header
LB: loop body
LE: loop exit
PB: predicated region body
PF: predicated region fallthrough
CT: control target
= control target key end

     0   :  { %v265_v0 = vlaneseq  ;;  %v995_v2 = vmov 1966171168   ;;  %vm338_vm0 = vcmask 7168   ;;  %s1208_s2 = inlined_call_operand.vmem [shape: bf16[256,128], index: 2, kind: input, shape index: {}]   ;;  %s1209_s0 = inlined_call_operand.vmem [shape: bf16[32,256], index: 0, kind: input, shape index: {}]   ;;  %s1210_s1 = inlined_call_operand.vmem [shape: bf16[1,256], index: 1, kind: input, shape index: {}]   ;;  %s1211_s3 = inlined_call_operand.vmem [shape: s8[256,128], index: 3, kind: input, shape index: {}]   ;;  %s1212_s5 = inlined_call_operand.vmem [shape: bf16[128,128], index: 5, kind: input, shape index: {}]   ;;  %s1213_s4 = inlined_call_operand.vmem [shape: f32[1,128], index: 4, kind: input, shape index: {}]   ;;  %s1214_s6 = inlined_call_operand.vmem [shape: f32[1,128], index: 6, kind: input, shape index: {}]   ;;  %s1215_s7 = inlined_call_operand.vmem [shape: bf16[32,128], index: 7, kind: output, shape index: {}]  }
   0x1   :  { %v957_v1 = vld [vmem:[%s1208_s2 + $0x78] sm:$0xff]   ;;  %v263_v3 = vunpack.c.l.s4 %v995_v2  ;;  %v959_v5 = vld [vmem:[%s1208_s2 + $0x70] sm:$0xff]   ;;  %v961_v9 = vld [vmem:[%s1208_s2 + $0x68] sm:$0xff]  }
   0x2   :  { %v958_v4 = vld [vmem:[%s1208_s2 + $0x38] sm:$0xff]   ;;  %803 = vmatprep.subr.bf16.mxu0 %v957_v1  ;;  %v960_v6 = vld [vmem:[%s1208_s2 + $0x30] sm:$0xff]   ;;  %v266_v8 = vshrl.u32 %v265_v0, 7  ;;  %v962_v10 = vld [vmem:[%s1208_s2 + $0x28] sm:$0xff]  }
   0x3   :  { %804 = vmatpush3.bf16.msra.mxu0 %v958_v4  ;;  %v264_v7 = vunpack.c.0.s8 %v263_v3  ;;  %v963_v12 = vld [vmem:[%s1208_s2 + $0x60] sm:$0xff]   ;;  %v32_v14 = vld [vmem:[%s1209_s0 + $0x8] sm:$0xff]  ;;  %v965_v21 = vld [vmem:[%s1208_s2 + $0x58] sm:$0xff]  }
   0x4   :  { %805 = vmatprep.subr.bf16.mxu0 %v959_v5  ;;  %v31_v13 = vld [vmem:[%s1209_s0] sm:$0xff]  ;;  %v281_v19 = vsub.s32 0, %v266_v8  ;;  %v966_v24 = vld [vmem:[%s1208_s2 + $0x18] sm:$0xff]   ;;  %v967_v27 = vld [vmem:[%s1208_s2 + $0x50] sm:$0xff]  }
   0x5   :  { %v267_v11 = vsub.s32 %v264_v7, %v266_v8  ;;  %v735_v15 = vld.sshfl [vmem:[%s1210_s1] sm:$0x11 pattern:$0x75316420]  ;;  %v712_v20 = vcombine.high %v31_v13, %v32_v14  ;;  %v33_v29 = vld [vmem:[%s1209_s0 + $0x10] sm:$0xff]  ;;  %v34_v30 = vld [vmem:[%s1209_s0 + $0x18] sm:$0xff]  ;;  %v711_v50 = vcombine.low %v31_v13, %v32_v14 }
   0x6   :  { %v964_v16 = vld [vmem:[%s1208_s2 + $0x20] sm:$0xff]   ;;  %v261_v17 = vcombine.high %v735_v15, %v735_v15  ;;  %v968_v32 = vld [vmem:[%s1208_s2 + $0x10] sm:$0xff]   ;;  %v969_v33 = vld [vmem:[%s1208_s2 + $0x48] sm:$0xff]   ;;  %v714_v51 = vcombine.high %v33_v29, %v34_v30  ;;  %v713_v53 = vcombine.low %v33_v29, %v34_v30 }
   0x7   :  { %806 = vmatpush3.bf16.msra.mxu0 %v960_v6  ;;  %v268_v18 = vrot.slane %v735_v15, %v267_v11  ;;  %215 = vmatprep.mubr.bf16.mxu0 %v712_v20  ;;  %v970_v40 = vld [vmem:[%s1208_s2 + $0x8] sm:$0xff]   ;;  %v971_v41 = vld [vmem:[%s1208_s2 + $0x40] sm:$0xff]   ;;  %v418_v54 = vld [vmem:[%s1211_s3 + $0x38] sm:$0xff] }
   0x8   :  { %807 = vmatprep.subr.bf16.mxu0 %v961_v9  ;;  %v275_v22 = vrot.slane %v261_v17, %v267_v11  ;;  %v972_v47 = vld [vmem:[%s1208_s2] sm:$0xff]   ;;  %v434_v55 = vunpack.c.h.s8.bf16 %v418_v54  ;;  %v414_v56 = vld [vmem:[%s1211_s3 + $0x18] sm:$0xff]  ;;  %v433_v58 = vunpack.c.l.s8.bf16 %v418_v54  ;;  %v417_v60 = vld [vmem:[%s1211_s3 + $0x30] sm:$0xff] }
   0x9   :  { %v277_v23 = vpack.i.b16 %v268_v18, %v268_v18  ;;  %v426_v57 = vunpack.c.h.s8.bf16 %v414_v56  ;;  %v425_v59 = vunpack.c.l.s8.bf16 %v414_v56  ;;  %v432_v61 = vunpack.c.h.s8.bf16 %v417_v60  ;;  %v413_v62 = vld [vmem:[%s1211_s3 + $0x10] sm:$0xff]  ;;  %v416_v2 = vld [vmem:[%s1211_s3 + $0x28] sm:$0xff]  ;;  %v415_v7 = vld [vmem:[%s1211_s3 + $0x20] sm:$0xff] }
   0xa   :  { %v284_v26 = vpack.i.b16 %v275_v22, %v275_v22  ;;  %831 = vmatprep.subr.bf16.mxu1 %v434_v55  ;;  %v424_v63 = vunpack.c.h.s8.bf16 %v413_v62  ;;  %v431_v0 = vunpack.c.l.s8.bf16 %v417_v60  ;;  %v423_v1 = vunpack.c.l.s8.bf16 %v413_v62  ;;  %v412_v3 = vld [vmem:[%s1211_s3 + $0x8] sm:$0xff]  ;;  %v977_v15 = vld [vmem:[%s1212_s5 + $0x38] sm:$0xff]   ;;  %v980_v18 = vld [vmem:[%s1212_s5 + $0x20] sm:$0xff]  }
   0xb   :  { %808 = vmatpush3.bf16.msra.mxu0 %v962_v10  ;;  %v282_v25 = vrot.slane %v277_v23, %v281_v19  ;;  %832 = vmatpush3.bf16.msra.mxu1 %v426_v57  ;;  %v430_v4 = vunpack.c.h.s8.bf16 %v416_v2  ;;  %v422_v5 = vunpack.c.h.s8.bf16 %v412_v3  ;;  %v429_v6 = vunpack.c.l.s8.bf16 %v416_v2  ;;  %v411_v10 = vld [vmem:[%s1211_s3] sm:$0xff]  ;;  %v979_v17 = vld [vmem:[%s1212_s5 + $0x28] sm:$0xff]   ;;  %v982_v20 = vld [vmem:[%s1212_s5 + $0x10] sm:$0xff]  }
   0xc   :  { %809 = vmatprep.subr.bf16.mxu0 %v963_v12  ;;  %v289_v28 = vrot.slane %v284_v26, %v281_v19  ;;  %833 = vmatprep.subr.bf16.mxu1 %v433_v58  ;;  %v421_v8 = vunpack.c.l.s8.bf16 %v412_v3  ;;  %v428_v9 = vunpack.c.h.s8.bf16 %v415_v7  ;;  %v420_v11 = vunpack.c.h.s8.bf16 %v411_v10  ;;  %v981_v19 = vld [vmem:[%s1212_s5 + $0x18] sm:$0xff]   ;;  %v985_v22 = vld [vmem:[%s1212_s5] sm:$0xff]  }
   0xd   :  { %v427_v12 = vunpack.c.l.s8.bf16 %v415_v7 }
   0xe   :  { %v736_v31 = vcombine.low %v282_v25, %v289_v28 }
   0xf   :  { %810 = vmatpush3.bf16.msra.mxu0 %v964_v16  ;;  %834 = vmatpush3.bf16.msra.mxu1 %v425_v59  ;;  %v978_v16 = vld [vmem:[%s1212_s5 + $0x30] sm:$0xff]  }
  0x10   :  { %811 = vmatprep.subr.bf16.mxu0 %v965_v21  ;;  %v1091_v34 = vmul.bf16 %v736_v31, %v31_v13  ;;  %v1093_v35 = vmul.bf16 %v736_v31, %v32_v14  ;;  %v1095_v36 = vmul.bf16 %v736_v31, %v33_v29  ;;  %v1097_v37 = vmul.bf16 %v736_v31, %v34_v30  ;;  %v983_v21 = vld [vmem:[%s1212_s5 + $0x8] sm:$0xff]  }
  0x11   :  { %835 = vmatprep.subr.bf16.mxu1 %v432_v61  ;;  %v419_v13 = vunpack.c.l.s8.bf16 %v411_v10  ;;  %v996_v14 = vmov 0  }
  0x12   :  { %v300_v38 = vand.u32 2147450879, %v1091_v34  ;;  %v301_v39 = vand.u32 2147450879, %v1093_v35  ;;  %v302_v44 = vand.u32 2147450879, %v1095_v36  ;;  %955 = vset.pattern.permute.xlu1 %v996_v14  ;;  %956 = vset.pattern.permute.xlu0 %v996_v14  ;;  %v360_v58 = vunpack.c.h.bf16 %v1095_v36 }
  0x13   :  { %812 = vmatpush3.bf16.msra.mxu0 %v966_v24  ;;  %v303_v45 = vand.u32 2147450879, %v1097_v37  ;;  %836 = vmatpush3.bf16.msra.mxu1 %v424_v63  ;;  %v362_v61 = vunpack.c.h.bf16 %v1097_v37 }
  0x14   :  { %813 = vmatprep.subr.bf16.mxu0 %v967_v27  ;;  %v737_v42 = vcombine.low %v300_v38, %v301_v39  ;;  %v738_v43 = vcombine.high %v300_v38, %v301_v39  ;;  %837 = vmatprep.subr.bf16.mxu1 %v431_v0 }
  0x15   :  { %v739_v48 = vcombine.low %v302_v44, %v303_v45  ;;  %v740_v49 = vcombine.high %v302_v44, %v303_v45  ;;  %v356_v44 = vunpack.c.h.bf16 %v1091_v34  ;;  %v358_v45 = vunpack.c.h.bf16 %v1093_v35 }
  0x16   :  { %v324_v46 = vmax.bf16 %v738_v43, %v737_v42  ;;  %v355_v43 = vunpack.c.l.bf16 %v1091_v34 }
  0x17   :  { %814 = vmatpush3.bf16.msra.mxu0 %v968_v32  ;;  %v327_v52 = vmax.bf16 %v740_v49, %v739_v48  ;;  %838 = vmatpush3.bf16.msra.mxu1 %v423_v1 }
  0x18   :  { %815 = vmatprep.subr.bf16.mxu0 %v969_v33  ;;  %325 = vmax.xlane.bf16.xlu0 %v324_v46  ;;  %v357_v46 = vunpack.c.l.bf16 %v1093_v35 }
  0x19   :  { %839 = vmatprep.subr.bf16.mxu1 %v430_v4 }
  0x1b   :  { %816 = vmatpush3.bf16.msra.mxu0 %v970_v40  ;;  %840 = vmatpush3.bf16.msra.mxu1 %v422_v5 }
  0x1c   :  { %817 = vmatprep.subr.bf16.mxu0 %v971_v41  ;;  %841 = vmatprep.subr.bf16.mxu1 %v429_v6 }
  0x1f   :  { %818 = vmatpush3.bf16.msra.mxu0 %v972_v47  ;;  %842 = vmatpush3.bf16.msra.mxu1 %v421_v8 }
  0x20   :  { %328 = vmax.xlane.bf16.xlu0 %v327_v52  ;;  %843 = vmatprep.subr.bf16.mxu1 %v428_v9  ;;  %v361_v9 = vunpack.c.l.bf16 %v1097_v37 }
  0x21   :  { %869 = vmatprep.subr.bf16.mxu0 %v977_v15 }
  0x22   :  { %216 = vmatmul.mubr.bf16.vlgmr.msra.gmra.mxu0 %v711_v50 }
  0x23   :  { %223 = vmatprep.mubr.bf16.mxu0 %v714_v51  ;;  %844 = vmatpush3.bf16.msra.mxu1 %v420_v11 }
  0x24   :  { %845 = vmatprep.subr.bf16.mxu1 %v427_v12  ;;  %870 = vmatpush3.bf16.msra.mxu0 %v977_v15 }
  0x25   :  { %871 = vmatprep.subr.bf16.mxu0 %v978_v16 }
  0x27   :  { %846 = vmatpush3.bf16.msra.mxu1 %v419_v13 }
  0x28   :  { %872 = vmatpush3.bf16.msra.mxu0 %v978_v16 }
  0x29   :  { %873 = vmatprep.subr.bf16.mxu0 %v979_v17 }
  0x2a   :  { %224 = vmatmul.mubr.bf16.gmra.mxu0 %v713_v53  ;;  %v359_v53 = vunpack.c.l.bf16 %v1095_v36 }
  0x2c   :  { %874 = vmatpush3.bf16.msra.mxu0 %v979_v17 }
  0x2d   :  { %875 = vmatprep.subr.bf16.mxu0 %v980_v18 }
  0x30   :  { %876 = vmatpush3.bf16.msra.mxu0 %v980_v18 }
  0x31   :  { %877 = vmatprep.subr.bf16.mxu0 %v981_v19 }
  0x34   :  { %878 = vmatpush3.bf16.msra.mxu0 %v981_v19 }
  0x35   :  { %879 = vmatprep.subr.bf16.mxu0 %v982_v20 }
  0x38   :  { %880 = vmatpush3.bf16.msra.mxu0 %v982_v20 }
  0x39   :  { %881 = vmatprep.subr.bf16.mxu0 %v983_v21 }
  0x3c   :  { %882 = vmatpush3.bf16.msra.mxu0 %v983_v21 }
  0x3d   :  { %883 = vmatprep.subr.bf16.mxu0 %v985_v22 }
  0x40   :  { %884 = vmatpush3.bf16.msra.mxu0 %v985_v22 }
  0xa5   :  { %v326_v23 = vpop.xlane.xlu0 %325 }
  0xa6   :  { %v330_v24 = vunpack.c.l.bf16 %v326_v23  ;;  %v331_v25 = vunpack.c.h.bf16 %v326_v23 }
  0xa8   :  { %v334_v26 = vmul.f32 0.007874016, %v330_v24  ;;  %v335_v27 = vmul.f32 0.007874016, %v331_v25 }
  0xaa   :  { %339 = vst.msk [vmem:[#allocation3] sm:$0xff] %vm338_vm0, %v334_v26  ;;  %340 = vst.msk [vmem:[#allocation3 + $0x8] sm:$0xff] %vm338_vm0, %v335_v27  ;;  %vm343_vm1 = vcmp.gt.f32.partialorder %v334_v26, 0.0  ;;  %vm344_vm2 = vcmp.gt.f32.partialorder %v335_v27, 0.0 }
  0xab   :  { %v347_v28 = vsel %vm343_vm1, %v334_v26, 1.0  ;;  %v348_v29 = vsel %vm344_vm2, %v335_v27, 1.0 }
  0xac   :  { %987 = vrcp.f32 %v347_v28 }
  0xad   :  { %989 = vrcp.f32 %v348_v29  ;;  %v329_v30 = vpop.xlane.xlu0 %328 }
  0xae   :  { %v332_v31 = vunpack.c.l.bf16 %v329_v30  ;;  %v333_v32 = vunpack.c.h.bf16 %v329_v30 }
  0xb0   :  { %v336_v33 = vmul.f32 0.007874016, %v332_v31  ;;  %v337_v38 = vmul.f32 0.007874016, %v333_v32 }
  0xb1   :  { %v633_v39 = vld [vmem:[#allocation3] sm:$0xff]  ;;  %v634_v42 = vld [vmem:[#allocation3 + $0x8] sm:$0xff] }
  0xb2   :  { %341 = vst.msk [vmem:[#allocation3 + $0x10] sm:$0xff] %vm338_vm0, %v336_v33  ;;  %342 = vst.msk [vmem:[#allocation3 + $0x18] sm:$0xff] %vm338_vm0, %v337_v38  ;;  %vm345_vm3 = vcmp.gt.f32.partialorder %v336_v33, 0.0  ;;  %vm346_vm4 = vcmp.gt.f32.partialorder %v337_v38, 0.0  ;;  %640 = vperm.xlu1 %955, %v633_v39  }
  0xb3   :  { %v349_v40 = vsel %vm345_vm3, %v336_v33, 1.0  ;;  %v350_v41 = vsel %vm346_vm4, %v337_v38, 1.0 }
  0xb4   :  { %991 = vrcp.f32 %v349_v40 }
  0xb5   :  { %993 = vrcp.f32 %v350_v41 }
  0xb6   :  { %645 = vperm.xlu1 %955, %v634_v42  }
  0xb9   :  { %v988_v47 = vpop.eup %987  ;;  %v636_v48 = vld [vmem:[#allocation3 + $0x18] sm:$0xff]  ;;  %v635_v49 = vld [vmem:[#allocation3 + $0x10] sm:$0xff] }
  0xba   :  { %v990_v50 = vpop.eup %989  ;;  %v364_v51 = vmul.f32 %v988_v47, %v356_v44  ;;  %v363_v52 = vmul.f32 %v988_v47, %v355_v43  ;;  %655 = vperm.xlu0 %956, %v636_v48   ;;  %650 = vperm.xlu1 %955, %v635_v49  }
  0xbb   :  { %v366_v54 = vmul.f32 %v990_v50, %v358_v45  ;;  %v365_v57 = vmul.f32 %v990_v50, %v357_v46 }
  0xbc   :  { %v897_v55 = vand.u32 2147483647, %v364_v51  ;;  %v899_v56 = vcvt.f32.s32 %v364_v51  ;;  %v889_v34 = vand.u32 2147483647, %v363_v52  ;;  %v891_v35 = vcvt.f32.s32 %v363_v52 }
  0xbd   :  { %v913_v59 = vand.u32 2147483647, %v366_v54  ;;  %v915_v60 = vcvt.f32.s32 %v366_v54  ;;  %v902_v63 = vand.u32 2147483648, %v364_v51  ;;  %v918_v0 = vand.u32 2147483648, %v366_v54 }
  0xbe   :  { %v900_v62 = vcvt.s32.f32 %v899_v56  ;;  %vm1171_vm5 = vcmp.lt.f32.partialorder %v897_v55, 8388608.0  ;;  %v892_v3 = vcvt.s32.f32 %v891_v35  ;;  %v894_v4 = vand.u32 2147483648, %v363_v52 }
  0xbf   :  { %v916_v2 = vcvt.s32.f32 %v915_v60  ;;  %vm1175_vm6 = vcmp.lt.f32.partialorder %v913_v59, 8388608.0  ;;  %vm1179_vm7 = vcmp.lt.f32.partialorder %v889_v34, 8388608.0  ;;  %v907_v7 = vcvt.f32.s32 %v365_v57 }
  0xc0   :  { %v901_v5 = vand.u32 2147483647, %v900_v62  ;;  %v893_v11 = vand.u32 2147483647, %v892_v3  ;;  %v905_v12 = vand.u32 2147483647, %v365_v57 }
  0xc1   :  { %v992_v8 = vpop.eup %991  ;;  %v917_v10 = vand.u32 2147483647, %v916_v2  ;;  %v908_v15 = vcvt.s32.f32 %v907_v7  ;;  %v910_v16 = vand.u32 2147483648, %v365_v57 }
  0xc2   :  { %v994_v13 = vpop.eup %993  ;;  %v903_v14 = vor.u32 %v902_v63, %v901_v5  ;;  %v368_v17 = vmul.f32 %v992_v8, %v360_v58  ;;  %v895_v19 = vor.u32 %v894_v4, %v893_v11  ;;  %v367_v21 = vmul.f32 %v992_v8, %v359_v53 }
  0xc3   :  { %v919_v18 = vor.u32 %v918_v0, %v917_v10  ;;  %v370_v20 = vmul.f32 %v994_v13, %v362_v61  ;;  %v909_v23 = vand.u32 2147483647, %v908_v15  ;;  %vm906_vm8 = vcmp.lt.f32.partialorder %v905_v12, 8388608.0 }
  0xc4   :  { %v904_v22 = vsel %vm1171_vm5, %v903_v14, %v364_v51  ;;  %v929_v24 = vand.u32 2147483647, %v368_v17  ;;  %v931_v25 = vcvt.f32.s32 %v368_v17  ;;  %v896_v26 = vsel %vm1179_vm7, %v895_v19, %v363_v52 }
  0xc5   :  { %v920_v37 = vsel %vm1175_vm6, %v919_v18, %v366_v54  ;;  %v369_v27 = vmul.f32 %v994_v13, %v361_v9  ;;  %v911_v29 = vor.u32 %v910_v16, %v909_v23  ;;  %v934_v31 = vand.u32 2147483648, %v368_v17 }
  0xc6   :  { %v800_v28 = vpack.c.bf16 %v920_v37, %v904_v22  ;;  %v932_v30 = vcvt.s32.f32 %v931_v25  ;;  %v945_v32 = vand.u32 2147483647, %v370_v20  ;;  %v947_v33 = vcvt.f32.s32 %v370_v20  ;;  %v759_v37 = vld [vmem:[%s1213_s4] ss:$0 sm:$0xff] }
  0xc7   :  { %v912_v38 = vsel %vm906_vm8, %v911_v29, %v365_v57  ;;  %vm1190_vm9 = vcmp.lt.f32.partialorder %v929_v24, 8388608.0  ;;  %v923_v41 = vcvt.f32.s32 %v367_v21  ;;  %v950_v44 = vand.u32 2147483648, %v370_v20 }
  0xc8   :  { %487 = vmatprep.mubr.bf16.mxu1 %v800_v28  ;;  %v933_v40 = vand.u32 2147483647, %v932_v30  ;;  %v799_v42 = vpack.c.bf16 %v912_v38, %v896_v26  ;;  %v948_v43 = vcvt.s32.f32 %v947_v33  ;;  %v921_v45 = vand.u32 2147483647, %v367_v21 }
  0xc9   :  { %v924_v47 = vcvt.s32.f32 %v923_v41  ;;  %v926_v48 = vand.u32 2147483648, %v367_v21  ;;  %v939_v49 = vcvt.f32.s32 %v369_v27  ;;  %v937_v51 = vand.u32 2147483647, %v369_v27 }
  0xca   :  { %v935_v46 = vor.u32 %v934_v31, %v933_v40  ;;  %488 = vmatmul.mubr.bf16.vlgmr.msra.gmra.mxu1 %v799_v42  ;;  %v949_v50 = vand.u32 2147483647, %v948_v43  ;;  %vm946_vm10 = vcmp.lt.f32.partialorder %v945_v32, 8388608.0  ;;  %v942_v54 = vand.u32 2147483648, %v369_v27 }
  0xcb   :  { %v925_v52 = vand.u32 2147483647, %v924_v47  ;;  %v940_v53 = vcvt.s32.f32 %v939_v49  ;;  %vm922_vm11 = vcmp.lt.f32.partialorder %v921_v45, 8388608.0  ;;  %vm938_vm12 = vcmp.lt.f32.partialorder %v937_v51, 8388608.0 }
  0xcc   :  { %v936_v55 = vsel %vm1190_vm9, %v935_v46, %v368_v17  ;;  %v951_v56 = vor.u32 %v950_v44, %v949_v50  ;;  %v760_v44 = vld [vmem:[%s1214_s6] ss:$0 sm:$0xff] }
  0xcd   :  { %v927_v57 = vor.u32 %v926_v48, %v925_v52  ;;  %v941_v34 = vand.u32 2147483647, %v940_v53 }
  0xce   :  { %v952_v58 = vsel %vm946_vm10, %v951_v56, %v370_v20 }
  0xcf   :  { %v802_v59 = vpack.c.bf16 %v952_v58, %v936_v55  ;;  %v928_v60 = vsel %vm922_vm11, %v927_v57, %v367_v21  ;;  %v943_v35 = vor.u32 %v942_v54, %v941_v34 }
  0xd1   :  { %495 = vmatprep.mubr.bf16.mxu1 %v802_v59  ;;  %v944_v61 = vsel %vm938_vm12, %v943_v35, %v369_v27 }
  0xd2   :  { %v801_v62 = vpack.c.bf16 %v944_v61, %v928_v60 }
  0xd4   :  { %496 = vmatmul.mubr.bf16.gmra.mxu1 %v801_v62 }
  0xe2   :  { %v819_v63 = vpop.f32.mrf.mxu0 }
  0xe4   :  { %v820_v0 = vpop.f32.mrf.mxu0 }
  0xe5   :  { %v821_v3 = vadd.f32 %v820_v0, %v819_v63 }
  0xe6   :  { %v822_v1 = vpop.f32.mrf.mxu0 }
  0xe8   :  { %v823_v2 = vpop.f32.mrf.mxu0 }
  0xe9   :  { %v824_v4 = vadd.f32 %v823_v2, %v822_v1 }
  0xea   :  { %v825_v5 = vpop.f32.mrf.mxu0 }
  0xeb   :  { %v780_v6 = vpack.c.bf16 %v824_v4, %v821_v3 }
  0xec   :  { %v826_v36 = vpop.f32.mrf.mxu0 }
  0xed   :  { %781 = vst [vmem:[#allocation4] sm:$0xff] %v780_v6   ;;  %v827_v9 = vadd.f32 %v826_v36, %v825_v5 }
  0xee   :  { %v828_v7 = vpop.f32.mrf.mxu0 }
  0xf0   :  { %v829_v8 = vpop.f32.mrf.mxu0 }
  0xf1   :  { %v830_v10 = vadd.f32 %v829_v8, %v828_v7 }
  0xf3   :  { %v785_v11 = vpack.c.bf16 %v830_v10, %v827_v9 }
  0xf4   :  { %v984_v12 = vld [vmem:[#allocation4] sm:$0xff]  }
  0xf5   :  { %797 = vst [vmem:[#allocation4 + $0x8] sm:$0xff] %v785_v11   ;;  %885 = vmatprep.mubr.bf16.mxu0 %v984_v12 }
  0xfc   :  { %v986_v13 = vld [vmem:[#allocation4 + $0x8] sm:$0xff]  }
  0xfd   :  { %886 = vmatmul.mubr.bf16.vlgmr.msra.gmra.mxu0 %v986_v13 }
 0x12d   :  { %v641_v19 = vpop.permute.xlu1 %640 }
 0x12e   :  { %v664_v31 = vmul.f32 %v759_v37, %v641_v19 }
 0x131   :  { %v646_v21 = vpop.permute.xlu1 %645 }
 0x132   :  { %v665_v40 = vmul.f32 %v759_v37, %v646_v21 }
 0x135   :  { %v651_v23 = vpop.permute.xlu1 %650  ;;  %v656_v26 = vpop.permute.xlu0 %655 }
 0x136   :  { %v666_v27 = vmul.f32 %v759_v37, %v651_v23  ;;  %v667_v32 = vmul.f32 %v759_v37, %v656_v26 }
 0x18a   :  { %v847_v14 = vpop.f32.mrf.mxu1 }
 0x18c   :  { %v848_v15 = vpop.f32.mrf.mxu1 }
 0x18d   :  { %v849_v28 = vadd.f32 %v848_v15, %v847_v14 }
 0x18e   :  { %v850_v16 = vpop.f32.mrf.mxu1 }
 0x18f   :  { %v668_v42 = vmul.f32 %v849_v28, %v664_v31 }
 0x190   :  { %v851_v17 = vpop.f32.mrf.mxu1 }
 0x191   :  { %v852_v33 = vadd.f32 %v851_v17, %v850_v16 }
 0x193   :  { %v669_v48 = vmul.f32 %v852_v33, %v665_v40 }
 0x194   :  { %v853_v18 = vpop.f32.mrf.mxu1 }
 0x196   :  { %v854_v20 = vpop.f32.mrf.mxu1 }
 0x197   :  { %v855_v25 = vadd.f32 %v854_v20, %v853_v18 }
 0x198   :  { %v856_v22 = vpop.f32.mrf.mxu1 }
 0x199   :  { %v670_v38 = vmul.f32 %v855_v25, %v666_v27 }
 0x19a   :  { %v857_v24 = vpop.f32.mrf.mxu1 }
 0x19b   :  { %v858_v29 = vadd.f32 %v857_v24, %v856_v22 }
 0x19d   :  { %v671_v43 = vmul.f32 %v858_v29, %v667_v32 }
 0x1bd   :  { %v887_v30 = vpop.f32.mrf.mxu0 }
 0x1be   :  { %v674_v41 = vadd.f32 %v887_v30, %v670_v38 }
 0x1bf   :  { %v618_v39 = vpop.f32.mrf.mxu0 }
 0x1c0   :  { %v672_v46 = vadd.f32 %v668_v42, %v618_v39  ;;  %v685_v50 = vadd.f32 %v760_v44, %v674_v41 }
 0x1c1   :  { %v888_v45 = vpop.f32.mrf.mxu0 }
 0x1c2   :  { %v675_v47 = vadd.f32 %v888_v45, %v671_v43  ;;  %v683_v53 = vadd.f32 %v760_v44, %v672_v46 }
 0x1c3   :  { %v621_v49 = vpop.f32.mrf.mxu0 }
 0x1c4   :  { %v686_v51 = vadd.f32 %v760_v44, %v675_v47  ;;  %v673_v52 = vadd.f32 %v669_v48, %v621_v49 }
 0x1c6   :  { %v795_v54 = vpack.c.bf16 %v686_v51, %v685_v50  ;;  %v684_v55 = vadd.f32 %v760_v44, %v673_v52 }
 0x1c8   :  { %798 = vst [vmem:[%s1215_s7 + $0x8] sm:$0xff] %v795_v54   ;;  %v790_v56 = vpack.c.bf16 %v684_v55, %v683_v53 }
 0x1ca   :  { %791 = vst [vmem:[%s1215_s7] sm:$0xff] %v790_v56  }

</bundles_post_ra>
